<compile_context>
chip_gen: v5e
topology: v5e:2x2
jax: 0.10.0
libtpu: 0.0.40
codegen_flags: <defaults>
</compile_context>

<pallas_src>
import numpy as np
import jax
import jax.numpy as jnp
from jax.experimental import pallas as pl
from jax.experimental.pallas import tpu as pltpu


# ----------------------------------------------------------------------------
# Fused 1x1 conv (+ optional residual skip) + bias + ReLU
# (BN eval-mode scale and pixel normalization are pre-folded into W, b)
# ----------------------------------------------------------------------------

def _conv1x1_kernel(x_ref, w_ref, b_ref, o_ref):
    y = jnp.dot(x_ref[...], w_ref[...], preferred_element_type=jnp.float32)
    o_ref[...] = jnp.maximum(y + b_ref[...], 0.0)


def _conv1x1_skip_kernel(x_ref, s_ref, w_ref, b_ref, o_ref):
    y = jnp.dot(x_ref[...] + s_ref[...], w_ref[...],
                preferred_element_type=jnp.float32)
    o_ref[...] = jnp.maximum(y + b_ref[...], 0.0)


def _pick_tile(m, target=512):
    """Largest sublane-aligned row tile <= target that divides m."""
    if m <= target:
        return m
    for t in (target, 256, 128, 64, 32, 16, 8):
        if m % t == 0:
            return t
    return m   # fallback: single block


def conv1x1_bias_relu(x, w, b, skip=None, tm_target=512):
    """x, skip: (M, Cin); w: (Cin, Cout); b: (1, Cout) -> relu((x[+skip]) @ w + b)."""
    M, Cin = x.shape
    Cout = w.shape[1]
    tm = _pick_tile(M, tm_target)
    grid = (M // tm,)
    row_in = pl.BlockSpec((tm, Cin), lambda i: (i, 0))
    w_spec = pl.BlockSpec((Cin, Cout), lambda i: (0, 0))
    b_spec = pl.BlockSpec((1, Cout), lambda i: (0, 0))
    out_spec = pl.BlockSpec((tm, Cout), lambda i: (i, 0))
    cparams = pltpu.CompilerParams(dimension_semantics=("parallel",))
    out_shape = jax.ShapeDtypeStruct((M, Cout), jnp.float32)
    if skip is None:
        return pl.pallas_call(
            _conv1x1_kernel, out_shape=out_shape, grid=grid,
            in_specs=[row_in, w_spec, b_spec], out_specs=out_spec,
            compiler_params=cparams)(x, w, b)
    return pl.pallas_call(
        _conv1x1_skip_kernel, out_shape=out_shape, grid=grid,
        in_specs=[row_in, row_in, w_spec, b_spec], out_specs=out_spec,
        compiler_params=cparams)(x, skip, w, b)


# ----------------------------------------------------------------------------
# 3x3 conv + bias (predictor): in-kernel im2col + one K=9*Cin matmul
# ----------------------------------------------------------------------------

def _conv3x3_kernel(x_ref, w_ref, b_ref, o_ref):
    # x: (1, H+2, W+2, Cin) zero-padded ; w: (9*Cin, Cout) ; b: (1, Cout)
    _, hp, wp, cin = x_ref.shape
    h, w = hp - 2, wp - 2
    cout = w_ref.shape[1]
    x = x_ref[...]
    cols = []
    for k in range(9):                                  # static unroll, im2col
        dy, dx = k // 3, k % 3
        cols.append(x[:, dy:dy + h, dx:dx + w, :].reshape(h * w, cin))
    patches = jnp.concatenate(cols, axis=-1)            # (H*W, 9*Cin) lane concat
    y = jnp.dot(patches, w_ref[...], preferred_element_type=jnp.float32)
    y = y + b_ref[...]
    o_ref[...] = y.reshape(1, h, w, cout)


def conv3x3_bias(x_nhwc, w, b):
    # x: (N, H, W, Cin); w: (9*Cin, Cout); b: (1, Cout) -> (N, H, W, Cout)
    N, H, W, Cin = x_nhwc.shape
    Cout = w.shape[1]
    xpad = jnp.pad(x_nhwc, ((0, 0), (1, 1), (1, 1), (0, 0)))   # glue halo pad
    return pl.pallas_call(
        _conv3x3_kernel,
        out_shape=jax.ShapeDtypeStruct((N, H, W, Cout), jnp.float32),
        grid=(N,),
        in_specs=[
            pl.BlockSpec((1, H + 2, W + 2, Cin), lambda n: (n, 0, 0, 0)),
            pl.BlockSpec((9 * Cin, Cout), lambda n: (0, 0)),
            pl.BlockSpec((1, Cout), lambda n: (0, 0)),
        ],
        out_specs=pl.BlockSpec((1, H, W, Cout), lambda n: (n, 0, 0, 0)),
        compiler_params=pltpu.CompilerParams(dimension_semantics=("parallel",)),
    )(xpad, w, b)


# ----------------------------------------------------------------------------
# Bilinear up-sampling (F.interpolate, mode='bilinear', align_corners=False)
# Single pallas_call: H-interp then W-interp back-to-back, intermediate stays
# on-core.  Works in the free (N, H, W*C) NHWC view -> lane-dense I/O.
# ----------------------------------------------------------------------------

def _bilinear_matrix_np(n_in, scale):
    n_out = n_in * scale
    A = np.zeros((n_out, n_in), np.float32)
    for o in range(n_out):
        src = (o + 0.5) / scale - 0.5
        src = max(src, 0.0)                  # PyTorch clamps negative coords
        i0 = min(int(np.floor(src)), n_in - 1)
        i1 = min(i0 + 1, n_in - 1)
        f = src - i0
        A[o, i0] += 1.0 - f
        A[o, i1] += f
    return A


def _upsample_kernel(x_ref, ah_ref, awt_ref, o_ref):
    # x: (1, H, W*C) ; ah: (Ho, H) ; awt: (W*C, Wo*C) == kron(Aw, I_C)^T
    _, h, wc = x_ref.shape
    ho = ah_ref.shape[0]
    woc = awt_ref.shape[1]
    x2 = x_ref[...].reshape(h, wc)
    t = jnp.dot(ah_ref[...], x2, preferred_element_type=jnp.float32)      # (Ho, W*C)
    y = jnp.dot(t, awt_ref[...], preferred_element_type=jnp.float32)      # (Ho, Wo*C)
    o_ref[...] = y.reshape(1, ho, woc)


def upsample_bilinear(x, scale):
    N, H, W, C = x.shape
    Ho, Wo = H * scale, W * scale
    ah = jnp.asarray(_bilinear_matrix_np(H, scale))                        # (Ho, H)
    aw = _bilinear_matrix_np(W, scale)                                     # (Wo, W)
    awt = jnp.asarray(np.kron(aw, np.eye(C, dtype=np.float32)).T)          # (W*C, Wo*C)
    x2 = x.reshape(N, H, W * C)                                            # free reshape
    out = pl.pallas_call(
        _upsample_kernel,
        out_shape=jax.ShapeDtypeStruct((N, Ho, Wo * C), jnp.float32),
        grid=(N,),
        in_specs=[
            pl.BlockSpec((1, H, W * C), lambda n: (n, 0, 0)),
            pl.BlockSpec((Ho, H), lambda n: (0, 0)),
            pl.BlockSpec((W * C, Wo * C), lambda n: (0, 0)),
        ],
        out_specs=pl.BlockSpec((1, Ho, Wo * C), lambda n: (n, 0, 0)),
        compiler_params=pltpu.CompilerParams(dimension_semantics=("parallel",)),
    )(x2, ah, awt)
    return out.reshape(N, Ho, Wo, C)


# ----------------------------------------------------------------------------
# DynamicNet4Seg (inference forward)
# ----------------------------------------------------------------------------

class DynamicNet4SegPallas:
    """Deterministic, synthetic-weight re-implementation of the forward pass."""

    NUM_LEVELS = 4          # in_features = layer_0 .. layer_3
    BASE_CHANNELS = 8       # channels double per level (required by decoder sums)
    BN_EPS = 1e-5

    def __init__(self, num_classes, key):
        self.num_classes = num_classes
        keys = jax.random.split(key, 2 * self.NUM_LEVELS + 1)

        pixel_mean = jnp.array([103.53, 116.28, 123.675], jnp.float32)
        pixel_std = jnp.array([57.375, 57.12, 58.395], jnp.float32)
        self.pixel_mean, self.pixel_std = pixel_mean, pixel_std

        # TODO(synk): cfg.build_backbone(cfg) defines a dynamic-routing backbone
        # that is config/checkpoint specific; replaced by a deterministic
        # synthetic pyramid (strided avg-pool + 1x1 conv + ReLU) with the
        # channel/stride layout the decoder head requires.
        # Pixel normalization (x - mean)/std commutes with avg-pool, so it is
        # folded here:  W' = W / std[:, None],  b' = -(mean/std) @ W.
        self.backbone_w, self.backbone_b = [], []
        for i in range(self.NUM_LEVELS):
            c_out = self.BASE_CHANNELS * (2 ** i)
            std = float(np.sqrt(2.0 / 3.0))
            wb = std * jax.random.normal(keys[i], (3, c_out), jnp.float32)
            self.backbone_w.append(wb / pixel_std[:, None])
            self.backbone_b.append(-(pixel_mean / pixel_std)[None, :] @ wb)

        # SemSegDecoderHead: per-level 1x1 conv (bias=False) + BN + ReLU.
        # BN eval (weight=1, bias=0, running stats (0,1)) == scale 1/sqrt(1+eps),
        # folded into the conv weights.
        bn_scale = float(1.0 / np.sqrt(1.0 + self.BN_EPS))
        self.dec_w, self.dec_b = [], []
        for i in range(self.NUM_LEVELS):
            c_in = self.BASE_CHANNELS * (2 ** i)
            c_out = c_in if i == 0 else c_in // 2
            std = float(np.sqrt(2.0 / c_in))          # kaiming fan_in
            w = std * jax.random.normal(keys[self.NUM_LEVELS + i],
                                        (c_in, c_out), jnp.float32)
            self.dec_w.append(w * bn_scale)
            self.dec_b.append(jnp.zeros((1, c_out), jnp.float32))

        # predictor: 3x3 conv, in=channels(layer_0), out=num_classes, bias=0.
        c_in = self.BASE_CHANNELS
        std = float(np.sqrt(2.0 / (c_in * 9)))
        self.pred_w = std * jax.random.normal(keys[-1], (9 * c_in, num_classes),
                                              jnp.float32)
        self.pred_b = jnp.zeros((1, num_classes), jnp.float32)

        # flops bookkeeping (scalars carried through like the PyTorch module)
        self.head_flops = jnp.float32(1.0)

    # ----- synthetic backbone -------------------------------------------------
    def _backbone(self, x_nhwc_raw):
        N, H, W, C = x_nhwc_raw.shape
        feats = {}
        for i in range(self.NUM_LEVELS):
            s = 4 * (2 ** i)
            h, w = H // s, W // s
            pooled = x_nhwc_raw.reshape(N, h, s, w, s, C).mean(axis=(2, 4))  # glue pool
            M = N * h * w
            feat = conv1x1_bias_relu(
                pooled.reshape(M, C), self.backbone_w[i], self.backbone_b[i]
            ).reshape(N, h, w, -1)
            feats[f"layer_{i}"] = feat
        expt_flops = jnp.float32(2.0)
        real_flops = jnp.float32(3.0)
        return feats, expt_flops, real_flops

    # ----- SemSegDecoderHead.forward (eval) ------------------------------------
    def _sem_seg_head(self, features):
        pred, pred_output = None, None
        for _index in range(self.NUM_LEVELS):
            out_index = self.NUM_LEVELS - _index - 1
            out_feat = features[f"layer_{out_index}"]
            n, h, w, c_in = out_feat.shape
            M = n * h * w
            skip = pred.reshape(M, c_in) if out_index <= 2 else None
            out = conv1x1_bias_relu(
                out_feat.reshape(M, c_in), self.dec_w[out_index],
                self.dec_b[out_index], skip=skip,
            ).reshape(n, h, w, -1)
            if out_index > 0:
                pred = upsample_bilinear(out, 2)
            else:
                pred_output = out
        logits = conv3x3_bias(pred_output, self.pred_w, self.pred_b)
        logits = upsample_bilinear(logits, 4)
        return logits, {}

    # ----- DynamicNet4Seg.forward (inference) ----------------------------------
    def forward(self, images_nchw):
        N, C, H, W = images_nchw.shape
        # normalization is folded into the backbone convs; only layout glue here.
        x_nhwc = jnp.transpose(images_nchw, (0, 2, 3, 1))

        features, expt_flops, real_flops = self._backbone(x_nhwc)
        results, _ = self._sem_seg_head(features)
        real_flops = real_flops + self.head_flops
        flops = {"real_flops": real_flops, "expt_flops": expt_flops}

        # sem_seg_postprocess: crop to image_size then resize to (height, width).
        # With height == width == padded size this is the identity.
        sem_seg_nchw = jnp.transpose(results, (0, 3, 1, 2))   # back to PyTorch NCHW
        processed = [{"sem_seg": sem_seg_nchw[i], "flops": flops} for i in range(N)]
        return processed


# ----------------------------------------------------------------------------
if __name__ == "__main__":
    key = jax.random.PRNGKey(0)
    k_img, k_params = jax.random.split(key)
    # batched_inputs: 2 images, (C=3, H=64, W=64), divisible by size_divisibility
    images = jax.random.uniform(k_img, (2, 3, 64, 64), jnp.float32, 0.0, 255.0)

    model = DynamicNet4SegPallas(num_classes=4, key=k_params)
    results = model.forward(images)

    sem = results[0]["sem_seg"]
    jax.block_until_ready(sem)
    assert sem.shape == (4, 64, 64)
    print("KERNEL_OK")
</pallas_src>

<mosaic_0001>
module attributes {stable_mosaic.version = 11 : i64} {
  func.func @_conv1x1_kernel(%arg0: i32, %arg1: memref<512x3xf32, #tpu.memory_space<vmem>>, %arg2: memref<3x8xf32, #tpu.memory_space<vmem>>, %arg3: memref<1x8xf32, #tpu.memory_space<vmem>>, %arg4: memref<512x8xf32, #tpu.memory_space<vmem>>) attributes {dimension_semantics = [#tpu.dimension_semantics<parallel>], iteration_bounds = array<i64: 1>, scalar_prefetch = 0 : i64, scratch_operands = 0 : i64, tpu.core_type = #tpu.core_type<tc>, window_params = [{transform_indices = @transform_0, window_bounds = array<i64: 512, 3>}, {pipeline_mode = #tpu.pipeline_mode<synchronous>, transform_indices = @transform_1, window_bounds = array<i64: 3, 8>}, {pipeline_mode = #tpu.pipeline_mode<synchronous>, transform_indices = @transform_2, window_bounds = array<i64: 1, 8>}, {transform_indices = @transform_3, window_bounds = array<i64: 512, 8>}]} {
    %c0 = arith.constant 0 : index
    %c0_0 = arith.constant 0 : index
    %0 = vector.load %arg1[%c0, %c0_0] : memref<512x3xf32, #tpu.memory_space<vmem>>, vector<512x3xf32>
    %c0_1 = arith.constant 0 : index
    %c0_2 = arith.constant 0 : index
    %1 = vector.load %arg2[%c0_1, %c0_2] : memref<3x8xf32, #tpu.memory_space<vmem>>, vector<3x8xf32>
    %cst = arith.constant dense<0.000000e+00> : vector<512x8xf32>
    %2 = tpu.matmul %0, %1, %cst {dimension_numbers = #tpu.dot_dimension_numbers<[1], [0], [0], [1], [0, 0, 1, 1], [], []>} : vector<512x3xf32>, vector<3x8xf32>, vector<512x8xf32> -> vector<512x8xf32>
    %c0_3 = arith.constant 0 : index
    %c0_4 = arith.constant 0 : index
    %3 = vector.load %arg3[%c0_3, %c0_4] : memref<1x8xf32, #tpu.memory_space<vmem>>, vector<1x8xf32>
    %4 = vector.broadcast %3 : vector<1x8xf32> to vector<512x8xf32>
    %5 = arith.addf %2, %4 : vector<512x8xf32>
    %cst_5 = arith.constant 0.000000e+00 : f32
    %6 = vector.broadcast %cst_5 : f32 to vector<512x8xf32>
    %7 = arith.maximumf %5, %6 : vector<512x8xf32>
    %c0_6 = arith.constant 0 : index
    %c0_7 = arith.constant 0 : index
    %8 = vector.load %arg4[%c0_6, %c0_7] : memref<512x8xf32, #tpu.memory_space<vmem>>, vector<512x8xf32>
    tpu.vector_store %arg4[%c0_6, %c0_7], %7 {strides = array<i32>} : memref<512x8xf32, #tpu.memory_space<vmem>>, vector<512x8xf32>,
    return
  }
  func.func @transform_0(%arg0: i32) -> (i32, i32) {
    %c0_i32 = arith.constant 0 : i32
    %c0_i32_0 = arith.constant 0 : i32
    return %arg0, %c0_i32 : i32, i32
  }
  func.func @transform_1(%arg0: i32) -> (i32, i32) {
    %c0_i32 = arith.constant 0 : i32
    %c0_i32_0 = arith.constant 0 : i32
    %c0_i32_1 = arith.constant 0 : i32
    return %c0_i32, %c0_i32_0 : i32, i32
  }
  func.func @transform_2(%arg0: i32) -> (i32, i32) {
    %c0_i32 = arith.constant 0 : i32
    %c0_i32_0 = arith.constant 0 : i32
    %c0_i32_1 = arith.constant 0 : i32
    return %c0_i32, %c0_i32_0 : i32, i32
  }
  func.func @transform_3(%arg0: i32) -> (i32, i32) {
    %c0_i32 = arith.constant 0 : i32
    %c0_i32_0 = arith.constant 0 : i32
    return %arg0, %c0_i32 : i32, i32
  }
}

</mosaic_0001>

<bundles_post_ra>
// kernel: tpu_custom_call.1
= control target key start
LH: loop header
LB: loop body
LE: loop exit
PB: predicated region body
PF: predicated region fallthrough
CT: control target
= control target key end

     0   :  { %vm276_vm0 = vcmask 1042432   ;;  %vm83_vm1 = vcmask 23552   ;;  %vm553_vm2 = vcmask 64512   ;;  %s1295_s1 = inlined_call_operand.vmem [shape: f32[3,8], index: 1, kind: input, shape index: {}]   ;;  %s1296_s0 = inlined_call_operand.vmem [shape: f32[512,3], index: 0, kind: input, shape index: {}]   ;;  %s1297_s2 = inlined_call_operand.vmem [shape: f32[1,8], index: 2, kind: input, shape index: {}]   ;;  %s1298_s3 = inlined_call_operand.vmem [shape: f32[512,8], index: 3, kind: output, shape index: {}]  }
   0x1   :  { %v78_v0 = vld [vmem:[%s1295_s1] sm:$0x7]  ;;  %v47_v5 = vld [vmem:[%s1296_s0 + $0x108] sm:$0xff]  ;;  %v48_v9 = vld [vmem:[%s1296_s0 + $0x110] sm:$0xff] }
   0x2   :  { %v46_v1 = vld [vmem:[%s1296_s0 + $0x100] sm:$0xff]  ;;  %688 = vmatpush.msk.msra.mxu2 %vm276_vm0, %v78_v0  ;;  %689 = vmatpush.msk.msra.mxu3 %vm276_vm0, %v78_v0  ;;  %v63_v6 = vld [vmem:[%s1296_s0 + $0x188] sm:$0xff]  ;;  %v64_v10 = vld [vmem:[%s1296_s0 + $0x190] sm:$0xff] }
   0x3   :  { %v62_v2 = vld [vmem:[%s1296_s0 + $0x180] sm:$0xff]  ;;  %655 = vmatmul.msk.f32.vlgmr.msra.gmra.mxu2 %vm83_vm1, %v46_v1  ;;  %622 = vmatpush.msk.msra.mxu0 %vm276_vm0, %v78_v0  ;;  %v15_v7 = vld [vmem:[%s1296_s0 + $0x8] sm:$0xff]  ;;  %v16_v11 = vld [vmem:[%s1296_s0 + $0x10] sm:$0xff] }
   0x4   :  { %v14_v3 = vld [vmem:[%s1296_s0] sm:$0xff]  ;;  %671 = vmatmul.msk.f32.vlgmr.msra.gmra.mxu3 %vm83_vm1, %v62_v2  ;;  %687 = vmatpush.msk.msra.mxu1 %vm276_vm0, %v78_v0  ;;  %v31_v8 = vld [vmem:[%s1296_s0 + $0x88] sm:$0xff]  ;;  %v32_v12 = vld [vmem:[%s1296_s0 + $0x90] sm:$0xff] }
   0x5   :  { %v30_v4 = vld [vmem:[%s1296_s0 + $0x80] sm:$0xff]  ;;  %623 = vmatmul.msk.f32.vlgmr.msra.gmra.mxu0 %vm83_vm1, %v14_v3  ;;  %v49_v13 = vld [vmem:[%s1296_s0 + $0x118] sm:$0xff]  ;;  %v51_v21 = vld [vmem:[%s1296_s0 + $0x128] sm:$0xff] }
   0x6   :  { %639 = vmatmul.msk.f32.vlgmr.msra.gmra.mxu1 %vm83_vm1, %v30_v4  ;;  %v65_v14 = vld [vmem:[%s1296_s0 + $0x198] sm:$0xff]  ;;  %v50_v17 = vld [vmem:[%s1296_s0 + $0x120] sm:$0xff]  ;;  %v67_v22 = vld [vmem:[%s1296_s0 + $0x1a8] sm:$0xff] }
   0x7   :  { %v17_v15 = vld [vmem:[%s1296_s0 + $0x18] sm:$0xff]  ;;  %v66_v18 = vld [vmem:[%s1296_s0 + $0x1a0] sm:$0xff]  ;;  %v19_v23 = vld [vmem:[%s1296_s0 + $0x28] sm:$0xff] }
   0x8   :  { %v33_v16 = vld [vmem:[%s1296_s0 + $0x98] sm:$0xff]  ;;  %v18_v19 = vld [vmem:[%s1296_s0 + $0x20] sm:$0xff]  ;;  %v35_v24 = vld [vmem:[%s1296_s0 + $0xa8] sm:$0xff] }
   0x9   :  { %v34_v20 = vld [vmem:[%s1296_s0 + $0xa0] sm:$0xff]  ;;  %v52_v25 = vld [vmem:[%s1296_s0 + $0x130] sm:$0xff]  ;;  %v53_v29 = vld [vmem:[%s1296_s0 + $0x138] sm:$0xff] }
   0xa   :  { %v68_v26 = vld [vmem:[%s1296_s0 + $0x1b0] sm:$0xff]  ;;  %v69_v30 = vld [vmem:[%s1296_s0 + $0x1b8] sm:$0xff]  ;;  %v54_v33 = vld [vmem:[%s1296_s0 + $0x140] sm:$0xff] }
   0xb   :  { %656 = vmatmul.msk.f32.gmra.mxu2 %vm83_vm1, %v47_v5  ;;  %v20_v27 = vld [vmem:[%s1296_s0 + $0x30] sm:$0xff]  ;;  %v21_v31 = vld [vmem:[%s1296_s0 + $0x38] sm:$0xff]  ;;  %v70_v34 = vld [vmem:[%s1296_s0 + $0x1c0] sm:$0xff] }
   0xc   :  { %672 = vmatmul.msk.f32.gmra.mxu3 %vm83_vm1, %v63_v6  ;;  %v36_v28 = vld [vmem:[%s1296_s0 + $0xb0] sm:$0xff]  ;;  %v37_v32 = vld [vmem:[%s1296_s0 + $0xb8] sm:$0xff]  ;;  %v22_v35 = vld [vmem:[%s1296_s0 + $0x40] sm:$0xff] }
   0xd   :  { %624 = vmatmul.msk.f32.gmra.mxu0 %vm83_vm1, %v15_v7  ;;  %v38_v36 = vld [vmem:[%s1296_s0 + $0xc0] sm:$0xff]  ;;  %v55_v37 = vld [vmem:[%s1296_s0 + $0x148] sm:$0xff]  ;;  %v56_v41 = vld [vmem:[%s1296_s0 + $0x150] sm:$0xff] }
   0xe   :  { %640 = vmatmul.msk.f32.gmra.mxu1 %vm83_vm1, %v31_v8  ;;  %v71_v38 = vld [vmem:[%s1296_s0 + $0x1c8] sm:$0xff]  ;;  %v72_v42 = vld [vmem:[%s1296_s0 + $0x1d0] sm:$0xff]  ;;  %v57_v45 = vld [vmem:[%s1296_s0 + $0x158] sm:$0xff] }
   0xf   :  { %v23_v39 = vld [vmem:[%s1296_s0 + $0x48] sm:$0xff]  ;;  %v24_v43 = vld [vmem:[%s1296_s0 + $0x50] sm:$0xff]  ;;  %v73_v46 = vld [vmem:[%s1296_s0 + $0x1d8] sm:$0xff] }
  0x10   :  { %v39_v40 = vld [vmem:[%s1296_s0 + $0xc8] sm:$0xff]  ;;  %v40_v44 = vld [vmem:[%s1296_s0 + $0xd0] sm:$0xff]  ;;  %v25_v47 = vld [vmem:[%s1296_s0 + $0x58] sm:$0xff] }
  0x11   :  { %v41_v48 = vld [vmem:[%s1296_s0 + $0xd8] sm:$0xff]  ;;  %v58_v49 = vld [vmem:[%s1296_s0 + $0x160] sm:$0xff]  ;;  %v59_v53 = vld [vmem:[%s1296_s0 + $0x168] sm:$0xff] }
  0x12   :  { %v74_v50 = vld [vmem:[%s1296_s0 + $0x1e0] sm:$0xff]  ;;  %v75_v54 = vld [vmem:[%s1296_s0 + $0x1e8] sm:$0xff]  ;;  %v60_v57 = vld [vmem:[%s1296_s0 + $0x170] sm:$0xff] }
  0x13   :  { %657 = vmatmul.msk.f32.gmra.mxu2 %vm83_vm1, %v48_v9  ;;  %v26_v51 = vld [vmem:[%s1296_s0 + $0x60] sm:$0xff]  ;;  %v27_v55 = vld [vmem:[%s1296_s0 + $0x68] sm:$0xff]  ;;  %v76_v58 = vld [vmem:[%s1296_s0 + $0x1f0] sm:$0xff] }
  0x14   :  { %673 = vmatmul.msk.f32.gmra.mxu3 %vm83_vm1, %v64_v10  ;;  %v42_v52 = vld [vmem:[%s1296_s0 + $0xe0] sm:$0xff]  ;;  %v43_v56 = vld [vmem:[%s1296_s0 + $0xe8] sm:$0xff]  ;;  %v28_v59 = vld [vmem:[%s1296_s0 + $0x70] sm:$0xff] }
  0x15   :  { %625 = vmatmul.msk.f32.gmra.mxu0 %vm83_vm1, %v16_v11  ;;  %v44_v60 = vld [vmem:[%s1296_s0 + $0xf0] sm:$0xff]  ;;  %v61_v61 = vld [vmem:[%s1296_s0 + $0x178] sm:$0xff]  ;;  %v973_v1 = vld [vmem:[%s1297_s2] ss:$0 sm:$0xff] }
  0x16   :  { %641 = vmatmul.msk.f32.gmra.mxu1 %vm83_vm1, %v32_v12  ;;  %v77_v62 = vld [vmem:[%s1296_s0 + $0x1f8] sm:$0xff] }
  0x17   :  { %v29_v63 = vld [vmem:[%s1296_s0 + $0x78] sm:$0xff] }
  0x18   :  { %v45_v0 = vld [vmem:[%s1296_s0 + $0xf8] sm:$0xff] }
  0x1b   :  { %658 = vmatmul.msk.f32.gmra.mxu2 %vm83_vm1, %v49_v13 }
  0x1c   :  { %674 = vmatmul.msk.f32.gmra.mxu3 %vm83_vm1, %v65_v14 }
  0x1d   :  { %626 = vmatmul.msk.f32.gmra.mxu0 %vm83_vm1, %v17_v15 }
  0x1e   :  { %642 = vmatmul.msk.f32.gmra.mxu1 %vm83_vm1, %v33_v16 }
  0x23   :  { %659 = vmatmul.msk.f32.gmra.mxu2 %vm83_vm1, %v50_v17 }
  0x24   :  { %675 = vmatmul.msk.f32.gmra.mxu3 %vm83_vm1, %v66_v18 }
  0x25   :  { %627 = vmatmul.msk.f32.gmra.mxu0 %vm83_vm1, %v18_v19 }
  0x26   :  { %643 = vmatmul.msk.f32.gmra.mxu1 %vm83_vm1, %v34_v20 }
  0x2b   :  { %660 = vmatmul.msk.f32.gmra.mxu2 %vm83_vm1, %v51_v21 }
  0x2c   :  { %676 = vmatmul.msk.f32.gmra.mxu3 %vm83_vm1, %v67_v22 }
  0x2d   :  { %628 = vmatmul.msk.f32.gmra.mxu0 %vm83_vm1, %v19_v23 }
  0x2e   :  { %644 = vmatmul.msk.f32.gmra.mxu1 %vm83_vm1, %v35_v24 }
  0x33   :  { %661 = vmatmul.msk.f32.gmra.mxu2 %vm83_vm1, %v52_v25 }
  0x34   :  { %677 = vmatmul.msk.f32.gmra.mxu3 %vm83_vm1, %v68_v26 }
  0x35   :  { %629 = vmatmul.msk.f32.gmra.mxu0 %vm83_vm1, %v20_v27 }
  0x36   :  { %645 = vmatmul.msk.f32.gmra.mxu1 %vm83_vm1, %v36_v28 }
  0x3b   :  { %662 = vmatmul.msk.f32.gmra.mxu2 %vm83_vm1, %v53_v29 }
  0x3c   :  { %678 = vmatmul.msk.f32.gmra.mxu3 %vm83_vm1, %v69_v30 }
  0x3d   :  { %630 = vmatmul.msk.f32.gmra.mxu0 %vm83_vm1, %v21_v31 }
  0x3e   :  { %646 = vmatmul.msk.f32.gmra.mxu1 %vm83_vm1, %v37_v32 }
  0x43   :  { %663 = vmatmul.msk.f32.gmra.mxu2 %vm83_vm1, %v54_v33 }
  0x44   :  { %679 = vmatmul.msk.f32.gmra.mxu3 %vm83_vm1, %v70_v34 }
  0x45   :  { %631 = vmatmul.msk.f32.gmra.mxu0 %vm83_vm1, %v22_v35 }
  0x46   :  { %647 = vmatmul.msk.f32.gmra.mxu1 %vm83_vm1, %v38_v36 }
  0x4b   :  { %664 = vmatmul.msk.f32.gmra.mxu2 %vm83_vm1, %v55_v37 }
  0x4c   :  { %680 = vmatmul.msk.f32.gmra.mxu3 %vm83_vm1, %v71_v38 }
  0x4d   :  { %632 = vmatmul.msk.f32.gmra.mxu0 %vm83_vm1, %v23_v39 }
  0x4e   :  { %648 = vmatmul.msk.f32.gmra.mxu1 %vm83_vm1, %v39_v40 }
  0x53   :  { %665 = vmatmul.msk.f32.gmra.mxu2 %vm83_vm1, %v56_v41 }
  0x54   :  { %681 = vmatmul.msk.f32.gmra.mxu3 %vm83_vm1, %v72_v42 }
  0x55   :  { %633 = vmatmul.msk.f32.gmra.mxu0 %vm83_vm1, %v24_v43 }
  0x56   :  { %649 = vmatmul.msk.f32.gmra.mxu1 %vm83_vm1, %v40_v44 }
  0x5b   :  { %666 = vmatmul.msk.f32.gmra.mxu2 %vm83_vm1, %v57_v45 }
  0x5c   :  { %682 = vmatmul.msk.f32.gmra.mxu3 %vm83_vm1, %v73_v46 }
  0x5d   :  { %634 = vmatmul.msk.f32.gmra.mxu0 %vm83_vm1, %v25_v47 }
  0x5e   :  { %650 = vmatmul.msk.f32.gmra.mxu1 %vm83_vm1, %v41_v48 }
  0x63   :  { %667 = vmatmul.msk.f32.gmra.mxu2 %vm83_vm1, %v58_v49 }
  0x64   :  { %683 = vmatmul.msk.f32.gmra.mxu3 %vm83_vm1, %v74_v50 }
  0x65   :  { %635 = vmatmul.msk.f32.gmra.mxu0 %vm83_vm1, %v26_v51 }
  0x66   :  { %651 = vmatmul.msk.f32.gmra.mxu1 %vm83_vm1, %v42_v52 }
  0x6b   :  { %668 = vmatmul.msk.f32.gmra.mxu2 %vm83_vm1, %v59_v53 }
  0x6c   :  { %684 = vmatmul.msk.f32.gmra.mxu3 %vm83_vm1, %v75_v54 }
  0x6d   :  { %636 = vmatmul.msk.f32.gmra.mxu0 %vm83_vm1, %v27_v55 }
  0x6e   :  { %652 = vmatmul.msk.f32.gmra.mxu1 %vm83_vm1, %v43_v56 }
  0x73   :  { %669 = vmatmul.msk.f32.gmra.mxu2 %vm83_vm1, %v60_v57 }
  0x74   :  { %685 = vmatmul.msk.f32.gmra.mxu3 %vm83_vm1, %v76_v58 }
  0x75   :  { %637 = vmatmul.msk.f32.gmra.mxu0 %vm83_vm1, %v28_v59 }
  0x76   :  { %653 = vmatmul.msk.f32.gmra.mxu1 %vm83_vm1, %v44_v60 }
  0x7b   :  { %670 = vmatmul.msk.f32.gmra.mxu2 %vm83_vm1, %v61_v61 }
  0x7c   :  { %686 = vmatmul.msk.f32.gmra.mxu3 %vm83_vm1, %v77_v62 }
  0x7d   :  { %638 = vmatmul.msk.f32.gmra.mxu0 %vm83_vm1, %v29_v63 }
  0x7e   :  { %654 = vmatmul.msk.f32.gmra.mxu1 %vm83_vm1, %v45_v0 }
  0x82   :  { %v297_v2 = vpop.f32.mrf.mxu0 }
  0x83   :  { %v345_v3 = vpop.f32.mrf.mxu1  ;;  %v298_v4 = vadd.f32 %v973_v1, %v297_v2 }
  0x84   :  { %v346_v5 = vadd.f32 %v973_v1, %v345_v3 }
  0x85   :  { %v489_v6 = vmax.f32 %v298_v4, 0.0 }
  0x86   :  { %v505_v7 = vmax.f32 %v346_v5, 0.0  ;;  %v393_v8 = vpop.f32.mrf.mxu2 }
  0x87   :  { %v441_v9 = vpop.f32.mrf.mxu3  ;;  %554 = vst.msk [vmem:[%s1298_s3] sm:$0xff] %vm553_vm2, %v489_v6  ;;  %v394_v10 = vadd.f32 %v973_v1, %v393_v8 }
  0x88   :  { %v442_v11 = vadd.f32 %v973_v1, %v441_v9  ;;  %570 = vst.msk [vmem:[%s1298_s3 + $0x80] sm:$0xff] %vm553_vm2, %v505_v7 }
  0x89   :  { %v521_v12 = vmax.f32 %v394_v10, 0.0 }
  0x8a   :  { %v537_v13 = vmax.f32 %v442_v11, 0.0  ;;  %v300_v14 = vpop.f32.mrf.mxu0 }
  0x8b   :  { %v348_v15 = vpop.f32.mrf.mxu1  ;;  %586 = vst.msk [vmem:[%s1298_s3 + $0x100] sm:$0xff] %vm553_vm2, %v521_v12  ;;  %v301_v16 = vadd.f32 %v973_v1, %v300_v14 }
  0x8c   :  { %v349_v17 = vadd.f32 %v973_v1, %v348_v15  ;;  %602 = vst.msk [vmem:[%s1298_s3 + $0x180] sm:$0xff] %vm553_vm2, %v537_v13 }
  0x8d   :  { %v490_v18 = vmax.f32 %v301_v16, 0.0 }
  0x8e   :  { %v506_v19 = vmax.f32 %v349_v17, 0.0  ;;  %v396_v20 = vpop.f32.mrf.mxu2 }
  0x8f   :  { %v444_v21 = vpop.f32.mrf.mxu3  ;;  %555 = vst.msk [vmem:[%s1298_s3 + $0x8] sm:$0xff] %vm553_vm2, %v490_v18  ;;  %v397_v22 = vadd.f32 %v973_v1, %v396_v20 }
  0x90   :  { %v445_v23 = vadd.f32 %v973_v1, %v444_v21  ;;  %571 = vst.msk [vmem:[%s1298_s3 + $0x88] sm:$0xff] %vm553_vm2, %v506_v19 }
  0x91   :  { %v522_v24 = vmax.f32 %v397_v22, 0.0 }
  0x92   :  { %v538_v25 = vmax.f32 %v445_v23, 0.0  ;;  %v303_v26 = vpop.f32.mrf.mxu0 }
  0x93   :  { %v351_v27 = vpop.f32.mrf.mxu1  ;;  %587 = vst.msk [vmem:[%s1298_s3 + $0x108] sm:$0xff] %vm553_vm2, %v522_v24  ;;  %v304_v28 = vadd.f32 %v973_v1, %v303_v26 }
  0x94   :  { %v352_v29 = vadd.f32 %v973_v1, %v351_v27  ;;  %603 = vst.msk [vmem:[%s1298_s3 + $0x188] sm:$0xff] %vm553_vm2, %v538_v25 }
  0x95   :  { %v491_v30 = vmax.f32 %v304_v28, 0.0 }
  0x96   :  { %v507_v31 = vmax.f32 %v352_v29, 0.0  ;;  %v399_v32 = vpop.f32.mrf.mxu2 }
  0x97   :  { %v447_v33 = vpop.f32.mrf.mxu3  ;;  %556 = vst.msk [vmem:[%s1298_s3 + $0x10] sm:$0xff] %vm553_vm2, %v491_v30  ;;  %v400_v34 = vadd.f32 %v973_v1, %v399_v32 }
  0x98   :  { %v448_v35 = vadd.f32 %v973_v1, %v447_v33  ;;  %572 = vst.msk [vmem:[%s1298_s3 + $0x90] sm:$0xff] %vm553_vm2, %v507_v31 }
  0x99   :  { %v523_v36 = vmax.f32 %v400_v34, 0.0 }
  0x9a   :  { %v539_v37 = vmax.f32 %v448_v35, 0.0  ;;  %v306_v38 = vpop.f32.mrf.mxu0 }
  0x9b   :  { %v354_v39 = vpop.f32.mrf.mxu1  ;;  %588 = vst.msk [vmem:[%s1298_s3 + $0x110] sm:$0xff] %vm553_vm2, %v523_v36  ;;  %v307_v40 = vadd.f32 %v973_v1, %v306_v38 }
  0x9c   :  { %v355_v41 = vadd.f32 %v973_v1, %v354_v39  ;;  %604 = vst.msk [vmem:[%s1298_s3 + $0x190] sm:$0xff] %vm553_vm2, %v539_v37 }
  0x9d   :  { %v492_v42 = vmax.f32 %v307_v40, 0.0 }
  0x9e   :  { %v508_v43 = vmax.f32 %v355_v41, 0.0  ;;  %v402_v44 = vpop.f32.mrf.mxu2 }
  0x9f   :  { %v450_v45 = vpop.f32.mrf.mxu3  ;;  %557 = vst.msk [vmem:[%s1298_s3 + $0x18] sm:$0xff] %vm553_vm2, %v492_v42  ;;  %v403_v46 = vadd.f32 %v973_v1, %v402_v44 }
  0xa0   :  { %v451_v47 = vadd.f32 %v973_v1, %v450_v45  ;;  %573 = vst.msk [vmem:[%s1298_s3 + $0x98] sm:$0xff] %vm553_vm2, %v508_v43 }
  0xa1   :  { %v524_v48 = vmax.f32 %v403_v46, 0.0 }
  0xa2   :  { %v540_v49 = vmax.f32 %v451_v47, 0.0  ;;  %v309_v50 = vpop.f32.mrf.mxu0 }
  0xa3   :  { %v357_v51 = vpop.f32.mrf.mxu1  ;;  %589 = vst.msk [vmem:[%s1298_s3 + $0x118] sm:$0xff] %vm553_vm2, %v524_v48  ;;  %v310_v52 = vadd.f32 %v973_v1, %v309_v50 }
  0xa4   :  { %v358_v53 = vadd.f32 %v973_v1, %v357_v51  ;;  %605 = vst.msk [vmem:[%s1298_s3 + $0x198] sm:$0xff] %vm553_vm2, %v540_v49 }
  0xa5   :  { %v493_v54 = vmax.f32 %v310_v52, 0.0 }
  0xa6   :  { %v509_v55 = vmax.f32 %v358_v53, 0.0  ;;  %v405_v56 = vpop.f32.mrf.mxu2 }
  0xa7   :  { %v453_v57 = vpop.f32.mrf.mxu3  ;;  %558 = vst.msk [vmem:[%s1298_s3 + $0x20] sm:$0xff] %vm553_vm2, %v493_v54  ;;  %v406_v58 = vadd.f32 %v973_v1, %v405_v56 }
  0xa8   :  { %v454_v59 = vadd.f32 %v973_v1, %v453_v57  ;;  %574 = vst.msk [vmem:[%s1298_s3 + $0xa0] sm:$0xff] %vm553_vm2, %v509_v55 }
  0xa9   :  { %v525_v60 = vmax.f32 %v406_v58, 0.0 }
  0xaa   :  { %v541_v61 = vmax.f32 %v454_v59, 0.0  ;;  %v312_v62 = vpop.f32.mrf.mxu0 }
  0xab   :  { %v360_v63 = vpop.f32.mrf.mxu1  ;;  %590 = vst.msk [vmem:[%s1298_s3 + $0x120] sm:$0xff] %vm553_vm2, %v525_v60  ;;  %v313_v0 = vadd.f32 %v973_v1, %v312_v62 }
  0xac   :  { %v361_v2 = vadd.f32 %v973_v1, %v360_v63  ;;  %606 = vst.msk [vmem:[%s1298_s3 + $0x1a0] sm:$0xff] %vm553_vm2, %v541_v61 }
  0xad   :  { %v494_v3 = vmax.f32 %v313_v0, 0.0 }
  0xae   :  { %v510_v4 = vmax.f32 %v361_v2, 0.0  ;;  %v408_v5 = vpop.f32.mrf.mxu2 }
  0xaf   :  { %v456_v6 = vpop.f32.mrf.mxu3  ;;  %559 = vst.msk [vmem:[%s1298_s3 + $0x28] sm:$0xff] %vm553_vm2, %v494_v3  ;;  %v409_v7 = vadd.f32 %v973_v1, %v408_v5 }
  0xb0   :  { %v457_v8 = vadd.f32 %v973_v1, %v456_v6  ;;  %575 = vst.msk [vmem:[%s1298_s3 + $0xa8] sm:$0xff] %vm553_vm2, %v510_v4 }
  0xb1   :  { %v526_v9 = vmax.f32 %v409_v7, 0.0 }
  0xb2   :  { %v542_v10 = vmax.f32 %v457_v8, 0.0  ;;  %v315_v11 = vpop.f32.mrf.mxu0 }
  0xb3   :  { %v363_v12 = vpop.f32.mrf.mxu1  ;;  %591 = vst.msk [vmem:[%s1298_s3 + $0x128] sm:$0xff] %vm553_vm2, %v526_v9  ;;  %v316_v13 = vadd.f32 %v973_v1, %v315_v11 }
  0xb4   :  { %v364_v14 = vadd.f32 %v973_v1, %v363_v12  ;;  %607 = vst.msk [vmem:[%s1298_s3 + $0x1a8] sm:$0xff] %vm553_vm2, %v542_v10 }
  0xb5   :  { %v495_v15 = vmax.f32 %v316_v13, 0.0 }
  0xb6   :  { %v511_v16 = vmax.f32 %v364_v14, 0.0  ;;  %v411_v17 = vpop.f32.mrf.mxu2 }
  0xb7   :  { %v459_v18 = vpop.f32.mrf.mxu3  ;;  %560 = vst.msk [vmem:[%s1298_s3 + $0x30] sm:$0xff] %vm553_vm2, %v495_v15  ;;  %v412_v19 = vadd.f32 %v973_v1, %v411_v17 }
  0xb8   :  { %v460_v20 = vadd.f32 %v973_v1, %v459_v18  ;;  %576 = vst.msk [vmem:[%s1298_s3 + $0xb0] sm:$0xff] %vm553_vm2, %v511_v16 }
  0xb9   :  { %v527_v21 = vmax.f32 %v412_v19, 0.0 }
  0xba   :  { %v543_v22 = vmax.f32 %v460_v20, 0.0  ;;  %v318_v23 = vpop.f32.mrf.mxu0 }
  0xbb   :  { %v366_v24 = vpop.f32.mrf.mxu1  ;;  %592 = vst.msk [vmem:[%s1298_s3 + $0x130] sm:$0xff] %vm553_vm2, %v527_v21  ;;  %v319_v25 = vadd.f32 %v973_v1, %v318_v23 }
  0xbc   :  { %v367_v26 = vadd.f32 %v973_v1, %v366_v24  ;;  %608 = vst.msk [vmem:[%s1298_s3 + $0x1b0] sm:$0xff] %vm553_vm2, %v543_v22 }
  0xbd   :  { %v496_v27 = vmax.f32 %v319_v25, 0.0 }
  0xbe   :  { %v512_v28 = vmax.f32 %v367_v26, 0.0  ;;  %v414_v29 = vpop.f32.mrf.mxu2 }
  0xbf   :  { %v462_v30 = vpop.f32.mrf.mxu3  ;;  %561 = vst.msk [vmem:[%s1298_s3 + $0x38] sm:$0xff] %vm553_vm2, %v496_v27  ;;  %v415_v31 = vadd.f32 %v973_v1, %v414_v29 }
  0xc0   :  { %v463_v32 = vadd.f32 %v973_v1, %v462_v30  ;;  %577 = vst.msk [vmem:[%s1298_s3 + $0xb8] sm:$0xff] %vm553_vm2, %v512_v28 }
  0xc1   :  { %v528_v33 = vmax.f32 %v415_v31, 0.0 }
  0xc2   :  { %v544_v34 = vmax.f32 %v463_v32, 0.0  ;;  %v321_v35 = vpop.f32.mrf.mxu0 }
  0xc3   :  { %v369_v36 = vpop.f32.mrf.mxu1  ;;  %593 = vst.msk [vmem:[%s1298_s3 + $0x138] sm:$0xff] %vm553_vm2, %v528_v33  ;;  %v322_v37 = vadd.f32 %v973_v1, %v321_v35 }
  0xc4   :  { %v370_v38 = vadd.f32 %v973_v1, %v369_v36  ;;  %609 = vst.msk [vmem:[%s1298_s3 + $0x1b8] sm:$0xff] %vm553_vm2, %v544_v34 }
  0xc5   :  { %v497_v39 = vmax.f32 %v322_v37, 0.0 }
  0xc6   :  { %v513_v40 = vmax.f32 %v370_v38, 0.0  ;;  %v417_v41 = vpop.f32.mrf.mxu2 }
  0xc7   :  { %v465_v42 = vpop.f32.mrf.mxu3  ;;  %562 = vst.msk [vmem:[%s1298_s3 + $0x40] sm:$0xff] %vm553_vm2, %v497_v39  ;;  %v418_v43 = vadd.f32 %v973_v1, %v417_v41 }
  0xc8   :  { %v466_v44 = vadd.f32 %v973_v1, %v465_v42  ;;  %578 = vst.msk [vmem:[%s1298_s3 + $0xc0] sm:$0xff] %vm553_vm2, %v513_v40 }
  0xc9   :  { %v529_v45 = vmax.f32 %v418_v43, 0.0 }
  0xca   :  { %v545_v46 = vmax.f32 %v466_v44, 0.0  ;;  %v324_v47 = vpop.f32.mrf.mxu0 }
  0xcb   :  { %v372_v48 = vpop.f32.mrf.mxu1  ;;  %594 = vst.msk [vmem:[%s1298_s3 + $0x140] sm:$0xff] %vm553_vm2, %v529_v45  ;;  %v325_v49 = vadd.f32 %v973_v1, %v324_v47 }
  0xcc   :  { %v373_v50 = vadd.f32 %v973_v1, %v372_v48  ;;  %610 = vst.msk [vmem:[%s1298_s3 + $0x1c0] sm:$0xff] %vm553_vm2, %v545_v46 }
  0xcd   :  { %v498_v51 = vmax.f32 %v325_v49, 0.0 }
  0xce   :  { %v514_v52 = vmax.f32 %v373_v50, 0.0  ;;  %v420_v53 = vpop.f32.mrf.mxu2 }
  0xcf   :  { %v468_v54 = vpop.f32.mrf.mxu3  ;;  %563 = vst.msk [vmem:[%s1298_s3 + $0x48] sm:$0xff] %vm553_vm2, %v498_v51  ;;  %v421_v55 = vadd.f32 %v973_v1, %v420_v53 }
  0xd0   :  { %v469_v56 = vadd.f32 %v973_v1, %v468_v54  ;;  %579 = vst.msk [vmem:[%s1298_s3 + $0xc8] sm:$0xff] %vm553_vm2, %v514_v52 }
  0xd1   :  { %v530_v57 = vmax.f32 %v421_v55, 0.0 }
  0xd2   :  { %v546_v58 = vmax.f32 %v469_v56, 0.0  ;;  %v327_v59 = vpop.f32.mrf.mxu0 }
  0xd3   :  { %v375_v60 = vpop.f32.mrf.mxu1  ;;  %595 = vst.msk [vmem:[%s1298_s3 + $0x148] sm:$0xff] %vm553_vm2, %v530_v57  ;;  %v328_v61 = vadd.f32 %v973_v1, %v327_v59 }
  0xd4   :  { %v376_v62 = vadd.f32 %v973_v1, %v375_v60  ;;  %611 = vst.msk [vmem:[%s1298_s3 + $0x1c8] sm:$0xff] %vm553_vm2, %v546_v58 }
  0xd5   :  { %v499_v63 = vmax.f32 %v328_v61, 0.0 }
  0xd6   :  { %v515_v0 = vmax.f32 %v376_v62, 0.0  ;;  %v423_v2 = vpop.f32.mrf.mxu2 }
  0xd7   :  { %v471_v3 = vpop.f32.mrf.mxu3  ;;  %564 = vst.msk [vmem:[%s1298_s3 + $0x50] sm:$0xff] %vm553_vm2, %v499_v63  ;;  %v424_v4 = vadd.f32 %v973_v1, %v423_v2 }
  0xd8   :  { %v472_v5 = vadd.f32 %v973_v1, %v471_v3  ;;  %580 = vst.msk [vmem:[%s1298_s3 + $0xd0] sm:$0xff] %vm553_vm2, %v515_v0 }
  0xd9   :  { %v531_v6 = vmax.f32 %v424_v4, 0.0 }
  0xda   :  { %v547_v7 = vmax.f32 %v472_v5, 0.0  ;;  %v330_v8 = vpop.f32.mrf.mxu0 }
  0xdb   :  { %v378_v9 = vpop.f32.mrf.mxu1  ;;  %596 = vst.msk [vmem:[%s1298_s3 + $0x150] sm:$0xff] %vm553_vm2, %v531_v6  ;;  %v331_v10 = vadd.f32 %v973_v1, %v330_v8 }
  0xdc   :  { %v379_v11 = vadd.f32 %v973_v1, %v378_v9  ;;  %612 = vst.msk [vmem:[%s1298_s3 + $0x1d0] sm:$0xff] %vm553_vm2, %v547_v7 }
  0xdd   :  { %v500_v12 = vmax.f32 %v331_v10, 0.0 }
  0xde   :  { %v516_v13 = vmax.f32 %v379_v11, 0.0  ;;  %v426_v14 = vpop.f32.mrf.mxu2 }
  0xdf   :  { %v474_v15 = vpop.f32.mrf.mxu3  ;;  %565 = vst.msk [vmem:[%s1298_s3 + $0x58] sm:$0xff] %vm553_vm2, %v500_v12  ;;  %v427_v16 = vadd.f32 %v973_v1, %v426_v14 }
  0xe0   :  { %v475_v17 = vadd.f32 %v973_v1, %v474_v15  ;;  %581 = vst.msk [vmem:[%s1298_s3 + $0xd8] sm:$0xff] %vm553_vm2, %v516_v13 }
  0xe1   :  { %v532_v18 = vmax.f32 %v427_v16, 0.0 }
  0xe2   :  { %v548_v19 = vmax.f32 %v475_v17, 0.0  ;;  %v333_v20 = vpop.f32.mrf.mxu0 }
  0xe3   :  { %v381_v21 = vpop.f32.mrf.mxu1  ;;  %597 = vst.msk [vmem:[%s1298_s3 + $0x158] sm:$0xff] %vm553_vm2, %v532_v18  ;;  %v334_v22 = vadd.f32 %v973_v1, %v333_v20 }
  0xe4   :  { %v382_v23 = vadd.f32 %v973_v1, %v381_v21  ;;  %613 = vst.msk [vmem:[%s1298_s3 + $0x1d8] sm:$0xff] %vm553_vm2, %v548_v19 }
  0xe5   :  { %v501_v24 = vmax.f32 %v334_v22, 0.0 }
  0xe6   :  { %v517_v25 = vmax.f32 %v382_v23, 0.0  ;;  %v429_v26 = vpop.f32.mrf.mxu2 }
  0xe7   :  { %v477_v27 = vpop.f32.mrf.mxu3  ;;  %566 = vst.msk [vmem:[%s1298_s3 + $0x60] sm:$0xff] %vm553_vm2, %v501_v24  ;;  %v430_v28 = vadd.f32 %v973_v1, %v429_v26 }
  0xe8   :  { %v478_v29 = vadd.f32 %v973_v1, %v477_v27  ;;  %582 = vst.msk [vmem:[%s1298_s3 + $0xe0] sm:$0xff] %vm553_vm2, %v517_v25 }
  0xe9   :  { %v533_v30 = vmax.f32 %v430_v28, 0.0 }
  0xea   :  { %v549_v31 = vmax.f32 %v478_v29, 0.0  ;;  %v336_v32 = vpop.f32.mrf.mxu0 }
  0xeb   :  { %v384_v33 = vpop.f32.mrf.mxu1  ;;  %598 = vst.msk [vmem:[%s1298_s3 + $0x160] sm:$0xff] %vm553_vm2, %v533_v30  ;;  %v337_v34 = vadd.f32 %v973_v1, %v336_v32 }
  0xec   :  { %v385_v35 = vadd.f32 %v973_v1, %v384_v33  ;;  %614 = vst.msk [vmem:[%s1298_s3 + $0x1e0] sm:$0xff] %vm553_vm2, %v549_v31 }
  0xed   :  { %v502_v36 = vmax.f32 %v337_v34, 0.0 }
  0xee   :  { %v518_v37 = vmax.f32 %v385_v35, 0.0  ;;  %v432_v38 = vpop.f32.mrf.mxu2 }
  0xef   :  { %v480_v39 = vpop.f32.mrf.mxu3  ;;  %567 = vst.msk [vmem:[%s1298_s3 + $0x68] sm:$0xff] %vm553_vm2, %v502_v36  ;;  %v433_v40 = vadd.f32 %v973_v1, %v432_v38 }
  0xf0   :  { %v481_v41 = vadd.f32 %v973_v1, %v480_v39  ;;  %583 = vst.msk [vmem:[%s1298_s3 + $0xe8] sm:$0xff] %vm553_vm2, %v518_v37 }
  0xf1   :  { %v534_v42 = vmax.f32 %v433_v40, 0.0 }
  0xf2   :  { %v550_v43 = vmax.f32 %v481_v41, 0.0  ;;  %v339_v44 = vpop.f32.mrf.mxu0 }
  0xf3   :  { %v387_v45 = vpop.f32.mrf.mxu1  ;;  %599 = vst.msk [vmem:[%s1298_s3 + $0x168] sm:$0xff] %vm553_vm2, %v534_v42  ;;  %v340_v46 = vadd.f32 %v973_v1, %v339_v44 }
  0xf4   :  { %v388_v47 = vadd.f32 %v973_v1, %v387_v45  ;;  %615 = vst.msk [vmem:[%s1298_s3 + $0x1e8] sm:$0xff] %vm553_vm2, %v550_v43 }
  0xf5   :  { %v503_v48 = vmax.f32 %v340_v46, 0.0 }
  0xf6   :  { %v519_v49 = vmax.f32 %v388_v47, 0.0  ;;  %v435_v50 = vpop.f32.mrf.mxu2 }
  0xf7   :  { %v483_v51 = vpop.f32.mrf.mxu3  ;;  %568 = vst.msk [vmem:[%s1298_s3 + $0x70] sm:$0xff] %vm553_vm2, %v503_v48  ;;  %v436_v52 = vadd.f32 %v973_v1, %v435_v50 }
  0xf8   :  { %v484_v53 = vadd.f32 %v973_v1, %v483_v51  ;;  %584 = vst.msk [vmem:[%s1298_s3 + $0xf0] sm:$0xff] %vm553_vm2, %v519_v49 }
  0xf9   :  { %v535_v54 = vmax.f32 %v436_v52, 0.0 }
  0xfa   :  { %v551_v55 = vmax.f32 %v484_v53, 0.0  ;;  %v342_v56 = vpop.f32.mrf.mxu0 }
  0xfb   :  { %v390_v57 = vpop.f32.mrf.mxu1  ;;  %600 = vst.msk [vmem:[%s1298_s3 + $0x170] sm:$0xff] %vm553_vm2, %v535_v54  ;;  %v343_v58 = vadd.f32 %v973_v1, %v342_v56 }
  0xfc   :  { %v391_v59 = vadd.f32 %v973_v1, %v390_v57  ;;  %616 = vst.msk [vmem:[%s1298_s3 + $0x1f0] sm:$0xff] %vm553_vm2, %v551_v55 }
  0xfd   :  { %v504_v60 = vmax.f32 %v343_v58, 0.0 }
  0xfe   :  { %v520_v61 = vmax.f32 %v391_v59, 0.0  ;;  %v438_v62 = vpop.f32.mrf.mxu2 }
  0xff   :  { %v486_v63 = vpop.f32.mrf.mxu3  ;;  %569 = vst.msk [vmem:[%s1298_s3 + $0x78] sm:$0xff] %vm553_vm2, %v504_v60  ;;  %v439_v0 = vadd.f32 %v973_v1, %v438_v62 }
 0x100   :  { %v487_v2 = vadd.f32 %v973_v1, %v486_v63  ;;  %585 = vst.msk [vmem:[%s1298_s3 + $0xf8] sm:$0xff] %vm553_vm2, %v520_v61 }
 0x101   :  { %v536_v3 = vmax.f32 %v439_v0, 0.0 }
 0x102   :  { %v552_v4 = vmax.f32 %v487_v2, 0.0 }
 0x103   :  { %601 = vst.msk [vmem:[%s1298_s3 + $0x178] sm:$0xff] %vm553_vm2, %v536_v3 }
 0x104   :  { %617 = vst.msk [vmem:[%s1298_s3 + $0x1f8] sm:$0xff] %vm553_vm2, %v552_v4 }

</bundles_post_ra>
